<compile_context>
chip_gen: v7x
topology: tpu7x:2x2x1
jax: 0.10.0
libtpu: 0.0.40
codegen_flags: <defaults>
</compile_context>

<pallas_src>
import math

import jax
import jax.numpy as jnp
from jax.experimental import pallas as pl
from jax.experimental.pallas import tpu as pltpu

_SQRT2 = math.sqrt(2.0)
_LN_EPS = 1e-12


def _gelu_erf(x):
    # BERT/UNITER gelu: x * 0.5 * (1 + erf(x / sqrt(2)))
    return x * 0.5 * (1.0 + jax.lax.erf(x / _SQRT2))


def _round_up(x, m):
    return (x + m - 1) // m * m


def _cdiv(a, b):
    return (a + b - 1) // b


def _vmem_capacity_bytes():
    try:
        return int(pltpu.get_tpu_info().vmem_capacity_bytes)
    except Exception:
        return 64 * 1024 * 1024  # conservative fallback (v7x per-TC VMEM)


def _resident_spec(block_shape, index_map):
    # Grid-constant input: single-buffer it (double-buffering a constant block
    # only burns VMEM that is better spent on bigger row/vocab tiles).
    try:
        return pl.BlockSpec(block_shape, index_map, pipeline_mode=pl.Buffered(1))
    except TypeError:  # older jax without pipeline_mode on BlockSpec
        return pl.BlockSpec(block_shape, index_map)


def _pick_tile(total, target, align):
    """Tile size for one axis; padding waste bounded to < n_tiles * align."""
    total_al = _round_up(max(total, 1), align)
    target = max(align, _round_up(target, align))
    if total_al <= target:
        return total_al, total_al
    n_tiles = _cdiv(total_al, target)
    tile = _round_up(_cdiv(total_al, n_tiles), align)
    return tile, tile * n_tiles


# ----------------------------- kernels --------------------------------------

def transform_kernel(x_ref, w1_ref, b1_ref, gamma_ref, beta_ref, h_ref):
    # dense -> gelu(erf) -> LayerNorm(eps=1e-12); bf16 MXU operands, f32 math.
    h = jnp.dot(x_ref[...], w1_ref[...], preferred_element_type=jnp.float32)
    h = h + b1_ref[...]
    h = _gelu_erf(h)
    mean = jnp.mean(h, axis=-1, keepdims=True)
    var = jnp.mean(jnp.square(h - mean), axis=-1, keepdims=True)
    h = (h - mean) * jax.lax.rsqrt(var + _LN_EPS)
    h = h * gamma_ref[...] + beta_ref[...]
    # NOTE: h stored bf16 (decoder MXU operand, halves intermediate HBM traffic);
    # adds one rounding step vs. an all-f32 reference (covered by tolerance).
    h_ref[...] = h.astype(h_ref.dtype)


def decoder_kernel(h_ref, decw_ref, decb_ref, out_ref):
    # logits = h @ E^T + bias  (bf16 x bf16 -> f32 accumulate, lane-dense store)
    logits = jnp.dot(h_ref[...], decw_ref[...], preferred_element_type=jnp.float32)
    out_ref[...] = (logits + decb_ref[...]).astype(out_ref.dtype)


# ----------------------------- wrappers --------------------------------------

def prepare_params(params, *, tv=2048):
    """One-time weight prep (do NOT call per forward): transpose / pad / cast."""
    dense_w = jnp.asarray(params["dense_w"])      # [H_out, H_in] (torch layout)
    senti_emb = jnp.asarray(params["senti_emb"])  # [V, H]
    H = dense_w.shape[0]
    V = senti_emb.shape[0]

    TV, V_pad = _pick_tile(V, tv, 128)            # waste bounded to < n_tiles*128

    dec_w = jnp.pad(senti_emb.T, ((0, 0), (0, V_pad - V))).astype(jnp.bfloat16)
    dec_b = jnp.pad(
        jnp.asarray(params["decoder_bias"], jnp.float32).reshape(1, V),
        ((0, 0), (0, V_pad - V)))

    return {
        "H": H, "V": V, "V_pad": V_pad, "TV": TV,
        "w1_t": dense_w.T.astype(jnp.bfloat16),                              # [H,H]
        "b1": jnp.asarray(params["dense_b"], jnp.float32).reshape(1, H),
        "gamma": jnp.asarray(params["ln_gamma"], jnp.float32).reshape(1, H),
        "beta": jnp.asarray(params["ln_beta"], jnp.float32).reshape(1, H),
        "dec_w": dec_w,                                                       # [H,V_pad] bf16
        "dec_b": dec_b,                                                       # [1,V_pad] f32
    }


def bert_senti_head(hidden_states, prepared, *, tn=1024, out_dtype=jnp.float32):
    """hidden_states: [..., H]. Returns logits [..., V] in out_dtype."""
    H, V, V_pad, TV = prepared["H"], prepared["V"], prepared["V_pad"], prepared["TV"]
    orig_shape = hidden_states.shape
    assert orig_shape[-1] == H
    x = hidden_states.reshape(-1, H)
    N = x.shape[0]

    out_bytes = jnp.dtype(out_dtype).itemsize
    vmem_cap = _vmem_capacity_bytes()
    budget = min(48 << 20, int(vmem_cap * 0.6))   # leaves headroom on v7x (64 MiB)

    # Double-buffered decoder footprint: h tile + decw tile + out tile (+ dec_b).
    def dec_footprint(tn_):
        return 2 * (tn_ * H * 2 + H * TV * 2 + tn_ * TV * out_bytes + 8 * TV * 4)

    tn_target = max(8, _round_up(tn, 8))
    while dec_footprint(tn_target) > budget and tn_target > 8:
        tn_target = max(8, tn_target - 128)
    TN, N_pad = _pick_tile(N, tn_target, 8)       # row-padding waste bounded

    # Zero-padded rows hit LayerNorm with var=0; (h-mean)==0 exactly so the
    # result stays finite (== beta) and padded rows are sliced off below.
    x_p = jnp.pad(x, ((0, N_pad - N), (0, 0))).astype(jnp.bfloat16)

    grid_n = N_pad // TN

    # ---- transform: dense -> gelu -> LayerNorm (rows only, "parallel") ------
    t_footprint = H * H * 2 + 3 * 8 * H * 4 + 4 * TN * H * 2
    h = pl.pallas_call(
        transform_kernel,
        out_shape=jax.ShapeDtypeStruct((N_pad, H), jnp.bfloat16),
        grid_spec=pltpu.PrefetchScalarGridSpec(
            num_scalar_prefetch=0,
            grid=(grid_n,),
            in_specs=[
                pl.BlockSpec((TN, H), lambda i: (i, 0)),     # x rows
                _resident_spec((H, H), lambda i: (0, 0)),    # W1 (pre-transposed)
                _resident_spec((1, H), lambda i: (0, 0)),    # dense bias
                _resident_spec((1, H), lambda i: (0, 0)),    # LN gamma
                _resident_spec((1, H), lambda i: (0, 0)),    # LN beta
            ],
            out_specs=pl.BlockSpec((TN, H), lambda i: (i, 0)),
        ),
        compiler_params=pltpu.CompilerParams(
            dimension_semantics=("parallel",),
            vmem_limit_bytes=min(vmem_cap, max(16 << 20, t_footprint + (8 << 20))),
        ),
        cost_estimate=pl.CostEstimate(
            flops=2 * N_pad * H * H,
            transcendentals=N_pad * H,  # erf (advisory)
            bytes_accessed=N_pad * H * 2 + H * H * 2 + 3 * H * 4 + N_pad * H * 2,
        ),
    )(x_p, prepared["w1_t"], prepared["b1"], prepared["gamma"], prepared["beta"])

    # ---- decoder: h @ E^T + bias; both grid axes "parallel" -----------------
    out = pl.pallas_call(
        decoder_kernel,
        out_shape=jax.ShapeDtypeStruct((N_pad, V_pad), out_dtype),
        grid_spec=pltpu.PrefetchScalarGridSpec(
            num_scalar_prefetch=0,
            grid=(grid_n, V_pad // TV),
            in_specs=[
                pl.BlockSpec((TN, H), lambda i, j: (i, 0)),   # h rows
                pl.BlockSpec((H, TV), lambda i, j: (0, j)),   # decoder weight tile
                pl.BlockSpec((1, TV), lambda i, j: (0, j)),   # decoder bias tile
            ],
            out_specs=pl.BlockSpec((TN, TV), lambda i, j: (i, j)),
        ),
        compiler_params=pltpu.CompilerParams(
            dimension_semantics=("parallel", "parallel"),
            vmem_limit_bytes=min(vmem_cap, max(16 << 20, dec_footprint(TN) + (8 << 20))),
        ),
        cost_estimate=pl.CostEstimate(
            flops=2 * N_pad * H * V_pad,
            transcendentals=0,
            bytes_accessed=(N_pad * H * 2 + grid_n * H * V_pad * 2
                            + V_pad * 4 + N_pad * V_pad * out_bytes),
        ),
    )(h, prepared["dec_w"], prepared["dec_b"])

    return out[:N, :V].reshape(*orig_shape[:-1], V)


# ----------------------------- test harness ----------------------------------

def init_params(key, hidden_size, vocab_size):
    k1, k2 = jax.random.split(key, 2)
    return {
        "dense_w": jax.random.normal(k1, (hidden_size, hidden_size), jnp.float32) * 0.02,
        "dense_b": jnp.zeros((hidden_size,), jnp.float32),
        "ln_gamma": jnp.ones((hidden_size,), jnp.float32),
        "ln_beta": jnp.zeros((hidden_size,), jnp.float32),
        "senti_emb": jax.random.normal(k2, (vocab_size, hidden_size), jnp.float32) * 0.02,
        "decoder_bias": jnp.zeros((vocab_size,), jnp.float32),  # nn.Parameter(torch.zeros(V))
    }


def _reference(hidden_states, params):
    # Pure-JAX f32 reference (matches the PyTorch module's forward).
    H = hidden_states.shape[-1]
    x = hidden_states.reshape(-1, H)
    h = x @ params["dense_w"].T + params["dense_b"]
    h = _gelu_erf(h)
    mean = jnp.mean(h, axis=-1, keepdims=True)
    var = jnp.mean((h - mean) ** 2, axis=-1, keepdims=True)
    h = (h - mean) / jnp.sqrt(var + _LN_EPS)
    h = h * params["ln_gamma"] + params["ln_beta"]
    logits = h @ params["senti_emb"].T + params["decoder_bias"]
    return logits.reshape(*hidden_states.shape[:-1], -1)


if __name__ == "__main__":
    key = jax.random.PRNGKey(0)
    k_x, k_p = jax.random.split(key)

    batch, seq, hidden, vocab = 2, 8, 32, 64
    hidden_states = jax.random.normal(k_x, (batch, seq, hidden), jnp.float32)
    params = init_params(k_p, hidden, vocab)

    prepared = prepare_params(params)            # one-time weight prep
    out = bert_senti_head(hidden_states, prepared)
    out = jax.block_until_ready(out)

    ref = _reference(hidden_states, params)
    assert out.shape == (batch, seq, vocab)
    # bf16 MXU operands / bf16 intermediate h -> looser tolerance vs f32 reference.
    assert jnp.allclose(out, ref, atol=3e-2, rtol=3e-2), float(jnp.max(jnp.abs(out - ref)))

    print("KERNEL_OK")
</pallas_src>

<mosaic_0001>
module attributes {stable_mosaic.version = 11 : i64} {
  func.func @transform_kernel(%arg0: i32, %arg1: memref<16x32xbf16, #tpu.memory_space<vmem>>, %arg2: memref<32x32xbf16, #tpu.memory_space<vmem>>, %arg3: memref<1x32xf32, #tpu.memory_space<vmem>>, %arg4: memref<1x32xf32, #tpu.memory_space<vmem>>, %arg5: memref<1x32xf32, #tpu.memory_space<vmem>>, %arg6: memref<16x32xbf16, #tpu.memory_space<vmem>>) attributes {dimension_semantics = [#tpu.dimension_semantics<parallel>], iteration_bounds = array<i64: 1>, scalar_prefetch = 0 : i64, scratch_operands = 0 : i64, tpu.core_type = #tpu.core_type<tc>, window_params = [{transform_indices = @transform_0, window_bounds = array<i64: 16, 32>}, {pipeline_mode = #tpu.pipeline_mode<synchronous>, transform_indices = @transform_1, window_bounds = array<i64: 32, 32>}, {pipeline_mode = #tpu.pipeline_mode<synchronous>, transform_indices = @transform_2, window_bounds = array<i64: 1, 32>}, {pipeline_mode = #tpu.pipeline_mode<synchronous>, transform_indices = @transform_3, window_bounds = array<i64: 1, 32>}, {pipeline_mode = #tpu.pipeline_mode<synchronous>, transform_indices = @transform_4, window_bounds = array<i64: 1, 32>}, {transform_indices = @transform_5, window_bounds = array<i64: 16, 32>}]} {
    %c0 = arith.constant 0 : index
    %c0_0 = arith.constant 0 : index
    %0 = vector.load %arg1[%c0, %c0_0] : memref<16x32xbf16, #tpu.memory_space<vmem>>, vector<16x32xbf16>
    %c0_1 = arith.constant 0 : index
    %c0_2 = arith.constant 0 : index
    %1 = vector.load %arg2[%c0_1, %c0_2] : memref<32x32xbf16, #tpu.memory_space<vmem>>, vector<32x32xbf16>
    %cst = arith.constant dense<0.000000e+00> : vector<16x32xf32>
    %2 = tpu.matmul %0, %1, %cst {dimension_numbers = #tpu.dot_dimension_numbers<[1], [0], [0], [1], [0, 0, 1, 1], [], []>} : vector<16x32xbf16>, vector<32x32xbf16>, vector<16x32xf32> -> vector<16x32xf32>
    %c0_3 = arith.constant 0 : index
    %c0_4 = arith.constant 0 : index
    %3 = vector.load %arg3[%c0_3, %c0_4] : memref<1x32xf32, #tpu.memory_space<vmem>>, vector<1x32xf32>
    %4 = vector.broadcast %3 : vector<1x32xf32> to vector<16x32xf32>
    %5 = arith.addf %2, %4 : vector<16x32xf32>
    %cst_5 = arith.constant 5.000000e-01 : f32
    %6 = vector.broadcast %cst_5 : f32 to vector<16x32xf32>
    %7 = arith.mulf %5, %6 : vector<16x32xf32>
    %cst_6 = arith.constant 1.41421354 : f32
    %8 = vector.broadcast %cst_6 : f32 to vector<16x32xf32>
    %9 = arith.divf %5, %8 : vector<16x32xf32>
    %10 = math.erf %9 : vector<16x32xf32>
    %cst_7 = arith.constant 1.000000e+00 : f32
    %11 = vector.broadcast %cst_7 : f32 to vector<16x32xf32>
    %12 = arith.addf %11, %10 : vector<16x32xf32>
    %13 = arith.mulf %7, %12 : vector<16x32xf32>
    %cst_8 = arith.constant dense<0.000000e+00> : vector<16xf32>
    %14 = vector.multi_reduction <add>, %13, %cst_8 [1] : vector<16x32xf32> to vector<16xf32>
    %15 = vector.shape_cast %14 : vector<16xf32> to vector<16x1xf32>
    %cst_9 = arith.constant 3.200000e+01 : f32
    %16 = vector.broadcast %cst_9 : f32 to vector<16x1xf32>
    %17 = arith.divf %15, %16 : vector<16x1xf32>
    %18 = vector.broadcast %17 : vector<16x1xf32> to vector<16x32xf32>
    %19 = arith.subf %13, %18 : vector<16x32xf32>
    %20 = arith.mulf %19, %19 : vector<16x32xf32>
    %cst_10 = arith.constant dense<0.000000e+00> : vector<16xf32>
    %21 = vector.multi_reduction <add>, %20, %cst_10 [1] : vector<16x32xf32> to vector<16xf32>
    %22 = vector.shape_cast %21 : vector<16xf32> to vector<16x1xf32>
    %cst_11 = arith.constant 3.200000e+01 : f32
    %23 = vector.broadcast %cst_11 : f32 to vector<16x1xf32>
    %24 = arith.divf %22, %23 : vector<16x1xf32>
    %25 = vector.broadcast %17 : vector<16x1xf32> to vector<16x32xf32>
    %26 = arith.subf %13, %25 : vector<16x32xf32>
    %cst_12 = arith.constant 9.99999996E-13 : f32
    %27 = vector.broadcast %cst_12 : f32 to vector<16x1xf32>
    %28 = arith.addf %24, %27 : vector<16x1xf32>
    %29 = math.rsqrt %28 : vector<16x1xf32>
    %30 = vector.broadcast %29 : vector<16x1xf32> to vector<16x32xf32>
    %31 = arith.mulf %26, %30 : vector<16x32xf32>
    %c0_13 = arith.constant 0 : index
    %c0_14 = arith.constant 0 : index
    %32 = vector.load %arg4[%c0_13, %c0_14] : memref<1x32xf32, #tpu.memory_space<vmem>>, vector<1x32xf32>
    %33 = vector.broadcast %32 : vector<1x32xf32> to vector<16x32xf32>
    %34 = arith.mulf %31, %33 : vector<16x32xf32>
    %c0_15 = arith.constant 0 : index
    %c0_16 = arith.constant 0 : index
    %35 = vector.load %arg5[%c0_15, %c0_16] : memref<1x32xf32, #tpu.memory_space<vmem>>, vector<1x32xf32>
    %36 = vector.broadcast %35 : vector<1x32xf32> to vector<16x32xf32>
    %37 = arith.addf %34, %36 : vector<16x32xf32>
    %38 = arith.truncf %37 : vector<16x32xf32> to vector<16x32xbf16>
    %c0_17 = arith.constant 0 : index
    %c0_18 = arith.constant 0 : index
    %39 = vector.load %arg6[%c0_17, %c0_18] : memref<16x32xbf16, #tpu.memory_space<vmem>>, vector<16x32xbf16>
    tpu.vector_store %arg6[%c0_17, %c0_18], %38 {strides = array<i32>} : memref<16x32xbf16, #tpu.memory_space<vmem>>, vector<16x32xbf16>,
    return
  }
  func.func @transform_0(%arg0: i32) -> (i32, i32) {
    %c0_i32 = arith.constant 0 : i32
    %c0_i32_0 = arith.constant 0 : i32
    return %arg0, %c0_i32 : i32, i32
  }
  func.func @transform_1(%arg0: i32) -> (i32, i32) {
    %c0_i32 = arith.constant 0 : i32
    %c0_i32_0 = arith.constant 0 : i32
    %c0_i32_1 = arith.constant 0 : i32
    return %c0_i32, %c0_i32_0 : i32, i32
  }
  func.func @transform_2(%arg0: i32) -> (i32, i32) {
    %c0_i32 = arith.constant 0 : i32
    %c0_i32_0 = arith.constant 0 : i32
    %c0_i32_1 = arith.constant 0 : i32
    return %c0_i32, %c0_i32_0 : i32, i32
  }
  func.func @transform_3(%arg0: i32) -> (i32, i32) {
    %c0_i32 = arith.constant 0 : i32
    %c0_i32_0 = arith.constant 0 : i32
    %c0_i32_1 = arith.constant 0 : i32
    return %c0_i32, %c0_i32_0 : i32, i32
  }
  func.func @transform_4(%arg0: i32) -> (i32, i32) {
    %c0_i32 = arith.constant 0 : i32
    %c0_i32_0 = arith.constant 0 : i32
    %c0_i32_1 = arith.constant 0 : i32
    return %c0_i32, %c0_i32_0 : i32, i32
  }
  func.func @transform_5(%arg0: i32) -> (i32, i32) {
    %c0_i32 = arith.constant 0 : i32
    %c0_i32_0 = arith.constant 0 : i32
    return %arg0, %c0_i32 : i32, i32
  }
}

</mosaic_0001>

<bundles_post_ra>
// kernel: tpu_custom_call.1
= control target key start
LH: loop header
LB: loop body
LE: loop exit
PB: predicated region body
PF: predicated region fallthrough
CT: control target
= control target key end

     0   :  { %10 = vsyncpa [#allocation3], 0  ;;  %s418_s0 = inlined_call_operand.hbm [shape: bf16[16,32], index: 0, kind: input, shape index: {}]   ;;  %s419_s1 = inlined_call_operand.hbm [shape: bf16[32,32], index: 1, kind: input, shape index: {}]   ;;  %s420_s2 = inlined_call_operand.vmem [shape: f32[1,32], index: 2, kind: input, shape index: {}]   ;;  %s421_s3 = inlined_call_operand.vmem [shape: f32[1,32], index: 3, kind: input, shape index: {}]   ;;  %s422_s4 = inlined_call_operand.vmem [shape: f32[1,32], index: 4, kind: input, shape index: {}]   ;;  %s423_s5 = inlined_call_operand.hbm [shape: bf16[16,32], index: 5, kind: output, shape index: {}]  }
   0x1   :  { %11 = vsyncpa [#allocation6], 0 }
   0x2   :  { %12 = vsyncpa [#allocation4], 0  ;;  %s322_s18 = smov [#allocation2]   ;;  %s250_s22 = scalar_lea.hbm %s418_s0, 128 }
   0x3   :  { %s18_s19 = sshll.u32 %s322_s18, 4  ;;  %p251_p0 = scmp.ne.s32.totalorder %s418_s0, %s250_s22  ;;  %s19_s19 = int_to_ptr.vmem [resolvable:$true] %s18_s19 }
   0x4   :  { %p254_p1 = scmp.lt.u32.totalorder %s250_s22, %s418_s0 }
   0x6   :  { %p256_p2 = pnand %p254_p1, %p251_p0 }
   0x8   :  { %259 = shalt.err (!%p256_p2)
}
   0x9   :  { %s260_s27 = scalar_lea.vmem %s19_s19, 128  ;;  %p265_p4 = scmp.lt.s32.totalorder %s19_s19, %s19_s19 }
   0xa   :  { %p261_p3 = scmp.ne.s32.totalorder %s19_s19, %s260_s27  ;;  %p266_p5 = scmp.lt.s32.totalorder %s260_s27, %s260_s27 }
   0xc   :  { %p267_p6 = por %p266_p5, %p265_p4 }
   0xe   :  { %p268_p7 = pnand %p267_p6, %p261_p3 }
  0x10   :  { %271 = shalt.err (!%p268_p7)
}
  0x11   :  { %s323_s28 = smov 64   ;;  %s324_s29 = smov 4  }
  0x12   :  { %24 = dma.hbm_to_vmem [thread:$0]  %s418_s0, 128, %s19_s19, [#allocation3], %s323_s28, %s323_s28, %s324_s29  }
  0x13   :  { %s325_s7 = smov [#allocation5]   ;;  %s272_s11 = scalar_lea.hbm %s419_s1, 256 }
  0x14   :  { %s30_s8 = sshll.u32 %s325_s7, 4  ;;  %p273_p8 = scmp.ne.s32.totalorder %s419_s1, %s272_s11  ;;  %s31_s8 = int_to_ptr.vmem [resolvable:$true] %s30_s8 }
  0x15   :  { %p276_p9 = scmp.lt.u32.totalorder %s272_s11, %s419_s1 }
  0x17   :  { %p278_p10 = pnand %p276_p9, %p273_p8 }
  0x19   :  { %281 = shalt.err (!%p278_p10)
}
  0x1a   :  { %s282_s16 = scalar_lea.vmem %s31_s8, 256  ;;  %p287_p12 = scmp.lt.s32.totalorder %s31_s8, %s31_s8 }
  0x1b   :  { %p283_p11 = scmp.ne.s32.totalorder %s31_s8, %s282_s16  ;;  %p288_p13 = scmp.lt.s32.totalorder %s282_s16, %s282_s16 }
  0x1d   :  { %p289_p0 = por %p288_p13, %p287_p12 }
  0x1f   :  { %p290_p1 = pnand %p289_p0, %p283_p11 }
  0x21   :  { %293 = shalt.err (!%p290_p1)
}
  0x22   :  { %36 = dma.hbm_to_vmem [thread:$0]  %s419_s1, 256, %s31_s8, [#allocation6], %s323_s28, %s323_s28, %s324_s29  }
  0x23   :  { %316 = dma.done.wait [#allocation3], 128  }
  0x24   :  { %317 = vsyncadd [#allocation3], 4294967168 }
  0x25   :  { %318 = dma.done.wait [#allocation6], 256  }
  0x26   :  { %319 = vsyncadd [#allocation6], 4294967040  ;;  %v326_v0 = vmov 0.0   ;;  %vm327_vm0 = vmmov 0   ;;  %v239_v1 = vld [vmem:[#allocation5] sm:$0xff]   ;;  %v240_v2 = vld [vmem:[#allocation5 + $0x8] sm:$0xff]  }
  0x27   :  { %224 = vmatprep.subr.bf16.mxu0 %v326_v0  ;;  %228 = vmatprep.mubr.msk.bf16.mxu0 %vm327_vm0, %v326_v0  ;;  %v241_v3 = vld [vmem:[#allocation2] sm:$0xff]   ;;  %vm80_vm1 = vcmask 261120   ;;  %vm189_vm2 = vcmask 257024   ;;  %s328_s22 = smov [#allocation7]  }
  0x28   :  { %225 = vmatpush3.bf16.msra.mxu0 %v239_v1  ;;  %v210_v4 = vld [vmem:[%s420_s2] ss:$0 sm:$0xff]  ;;  %s197_s23 = sshll.u32 %s328_s22, 4  ;;  %s198_s23 = int_to_ptr.vmem [resolvable:$true] %s197_s23 }
  0x29   :  { %226 = vmatprep.subr.bf16.mxu0 %v326_v0  ;;  %v215_v40 = vld [vmem:[%s421_s3] ss:$0 sm:$0xff]  ;;  %s294_s3 = scalar_lea.vmem %s198_s23, 128  ;;  %p299_p3 = scmp.lt.s32.totalorder %s198_s23, %s198_s23 }
  0x2a   :  { %v216_v42 = vld [vmem:[%s422_s4] ss:$0 sm:$0xff]  ;;  %p295_p2 = scmp.ne.s32.totalorder %s198_s23, %s294_s3  ;;  %p300_p4 = scmp.lt.s32.totalorder %s294_s3, %s294_s3 }
  0x2c   :  { %227 = vmatpush3.bf16.msra.mxu0 %v240_v2  ;;  %p301_p5 = por %p300_p4, %p299_p3 }
  0x2e   :  { %p302_p6 = pnand %p301_p5, %p295_p2 }
  0x2f   :  { %229 = vmatmul.mubr.msk.bf16.vlgmr.msra.gmra.mrb[0].mxu0 %vm80_vm1, %v241_v3 }
 0x102   :  { %v118_v5 = vpop.f32.mrb[0].mxu0 }
 0x103   :  { %v119_v6 = vadd.f32 %v210_v4, %v118_v5  ;;  %v230_v7 = vpop.f32.mrb[1].mxu0 }
 0x104   :  { %v121_v8 = vpop.f32.mrb[2].mxu0 }
 0x105   :  { %v128_v9 = vmul.f32 0.70710677, %v119_v6  ;;  %v122_v10 = vadd.f32 %v210_v4, %v121_v8  ;;  %v231_v11 = vpop.f32.mrb[3].mxu0  ;;  %v125_v14 = vmul.f32 0.5, %v119_v6 }
 0x107   :  { %242 = verf.f32 %v128_v9  ;;  %v129_v12 = vmul.f32 0.70710677, %v122_v10  ;;  %v126_v17 = vmul.f32 0.5, %v122_v10 }
 0x109   :  { %244 = verf.f32 %v129_v12 }
 0x111   :  { %v243_v13 = vpop.eup %242 }
 0x112   :  { %v132_v15 = vadd.f32 1.0, %v243_v13 }
 0x113   :  { %v245_v16 = vpop.eup %244 }
 0x114   :  { %v134_v18 = vmul.f32 %v132_v15, %v125_v14  ;;  %v133_v19 = vadd.f32 1.0, %v245_v16 }
 0x116   :  { %v136_v20 = vsel %vm80_vm1, %v134_v18, 0.0  ;;  %v135_v21 = vmul.f32 %v133_v19, %v126_v17 }
 0x117   :  { %137 = vadd.xlane.f32.xlu0 %v136_v20 }
 0x118   :  { %v139_v22 = vsel %vm80_vm1, %v135_v21, 0.0 }
 0x11b   :  { %140 = vadd.xlane.f32.xlu0 %v139_v22 }
 0x1a4   :  { %v138_v23 = vpop.xlane.xlu0 %137 }
 0x1a5   :  { %v143_v24 = vmul.f32 0.03125, %v138_v23 }
 0x1a7   :  { %v145_v25 = vsub.f32 %v134_v18, %v143_v24 }
 0x1a8   :  { %v141_v26 = vpop.xlane.xlu0 %140 }
 0x1a9   :  { %v144_v27 = vmul.f32 0.03125, %v141_v26  ;;  %v147_v28 = vmul.f32 %v145_v25, %v145_v25 }
 0x1ab   :  { %v146_v29 = vsub.f32 %v135_v21, %v144_v27  ;;  %v149_v30 = vsel %vm80_vm1, %v147_v28, 0.0 }
 0x1ac   :  { %150 = vadd.xlane.f32.xlu1 %v149_v30 }
 0x1ad   :  { %v148_v31 = vmul.f32 %v146_v29, %v146_v29 }
 0x1af   :  { %v152_v32 = vsel %vm80_vm1, %v148_v31, 0.0 }
 0x1b0   :  { %153 = vadd.xlane.f32.xlu1 %v152_v32 }
 0x239   :  { %v151_v33 = vpop.xlane.xlu1 %150 }
 0x23a   :  { %v155_v34 = vmul.f32 0.03125, %v151_v33 }
 0x23c   :  { %v157_v35 = vadd.f32 1e-12, %v155_v34 }
 0x23d   :  { %v154_v36 = vpop.xlane.xlu1 %153 }
 0x23e   :  { %246 = vrsqrt.f32 %v157_v35  ;;  %v156_v37 = vmul.f32 0.03125, %v154_v36 }
 0x240   :  { %v158_v38 = vadd.f32 1e-12, %v156_v37 }
 0x242   :  { %248 = vrsqrt.f32 %v158_v38 }
 0x248   :  { %v247_v39 = vpop.eup %246 }
 0x249   :  { %v161_v41 = vmul.f32 %v247_v39, %v145_v25 }
 0x24b   :  { %v170_v43 = vmul.f32 %v215_v40, %v161_v41 }
 0x24c   :  { %v249_v44 = vpop.eup %248 }
 0x24d   :  { %v162_v45 = vmul.f32 %v249_v44, %v146_v29  ;;  %v179_v46 = vadd.f32 %v216_v42, %v170_v43 }
 0x24f   :  { %v171_v47 = vmul.f32 %v215_v40, %v162_v45  ;;  %v219_v48 = vpack.c.bf16 %v179_v46, %v179_v46 }
 0x251   :  { %v180_v49 = vadd.f32 %v216_v42, %v171_v47  ;;  %190 = vst.msk [vmem:[#allocation7] sm:$0xf] %vm189_vm2, %v219_v48 }
 0x253   :  { %v220_v50 = vpack.c.bf16 %v180_v49, %v180_v49 }
 0x255   :  { %191 = vst.msk [vmem:[#allocation7 + $0x4] sm:$0xf] %vm189_vm2, %v220_v50 }
 0x256   :  { %305 = shalt.err (!%p302_p6)
}
 0x257   :  { %s306_s25 = scalar_lea.hbm %s423_s5, 128 }
 0x258   :  { %p307_p7 = scmp.ne.s32.totalorder %s423_s5, %s306_s25  ;;  %p310_p8 = scmp.lt.u32.totalorder %s306_s25, %s423_s5 }
 0x25a   :  { %p312_p9 = pnand %p310_p8, %p307_p7 }
 0x25c   :  { %315 = shalt.err (!%p312_p9)
}
 0x25d   :  { %203 = dma.vmem_to_hbm [thread:$0]  %s198_s23, 128, %s423_s5, [#allocation4], %s323_s28, %s323_s28, %s324_s29  }
 0x25e   :  { %320 = dma.done.wait [#allocation4], 128  }
 0x25f   :  { %321 = vsyncadd [#allocation4], 4294967168 }
 0x260   :  { %207 = vsyncpa [#allocation3], 1 }
 0x261   :  { %208 = vsyncpa [#allocation6], 1 }
 0x262   :  { %209 = vsyncpa [#allocation4], 1 }

</bundles_post_ra>
